<compile_context>
chip_gen: v5e
topology: v5e:2x2
jax: 0.10.0
libtpu: 0.0.40
codegen_flags: <defaults>
</compile_context>

<pallas_src>
import functools

import jax
import jax.numpy as jnp
from jax.experimental import pallas as pl
from jax.experimental.pallas import tpu as pltpu

LANES = 128


def _round_up(x, m):
    return -(-x // m) * m


# ---------------------------------------------------------------------------
# Kernels
# ---------------------------------------------------------------------------
def _gcn_rnn_kernel(x_ref, m_ref, w_ref, b_ref, o_ref, *, gdep, alpha, mxu_dtype):
    # x_ref : (TB, V, C)   batch tile of inputs
    # m_ref : (TB, V, V)   fused operator, built in XLA:
    #                      m[b, w, v] = beta*adj0[b, v, w] + gamma*adj1[v, w]
    # w_ref : ((gdep+1)*C, OUT)  linear weight, already (in, out)
    # b_ref : (1, OUT)
    # o_ref : (TB, V, OUT)
    tb, v, c = x_ref.shape
    out = o_ref.shape[-1]

    x = x_ref[...].astype(jnp.float32)
    m = m_ref[...].astype(mxu_dtype)
    ax = alpha * x                                        # hoisted out of the loop

    # Split-K epilogue folded into the diffusion loop: only one hop tensor and
    # one accumulator stay live instead of (gdep+1) hop tensors.
    h = x
    acc = jnp.dot(h.reshape(tb * v, c).astype(mxu_dtype),
                  w_ref[0:c, :].astype(mxu_dtype),
                  preferred_element_type=jnp.float32)
    for k in range(1, gdep + 1):
        g = jnp.einsum('bwv,bvc->bwc', m, h.astype(mxu_dtype),
                       preferred_element_type=jnp.float32)
        h = ax + g
        acc += jnp.dot(h.reshape(tb * v, c).astype(mxu_dtype),
                       w_ref[k * c:(k + 1) * c, :].astype(mxu_dtype),
                       preferred_element_type=jnp.float32)
    # TODO(synk): for small V, build a block-diagonal (TB*V, TB*V) operator from
    # m and run each hop as one (TB*V, TB*V) @ (TB*V, C) matmul (one MXU pass).
    o_ref[...] = (acc + b_ref[...]).reshape(tb, v, out).astype(o_ref.dtype)


def _gcn_hyper_kernel(x_ref, at_ref, w1_ref, b1_ref, w2_ref, b2_ref,
                      w3_ref, b3_ref, o_ref, *, gdep, alpha, mxu_dtype):
    # x_ref : (V, TB, C)   node-major tile so each hop is one 2-D matmul
    # at_ref: (V, V)       shared operator, built in XLA: at[w, v] = gamma*adj[v, w]
    # w1/b1 : ((gdep+1)*C, H1P), (1, H1P)   fc1   (H1 zero-padded to 128)
    # w2/b2 : (H1P, H2P), (1, H2P)          fc2   (zero rows keep the pad exact)
    # w3/b3 : (H2P, OUT), (1, OUT)          fc3
    # o_ref : (V, TB, OUT)
    v, tb, c = x_ref.shape
    out = o_ref.shape[-1]

    x = x_ref[...].astype(jnp.float32).reshape(v, tb * c)   # (V, TB*C) lane-dense
    m = at_ref[...].astype(mxu_dtype)                        # (V, V)
    ax = alpha * x

    # Diffusion: each hop is ONE (V, V) @ (V, TB*C) matmul; fc1 split-K folded in.
    h = x
    acc = jnp.dot(h.reshape(v * tb, c).astype(mxu_dtype),
                  w1_ref[0:c, :].astype(mxu_dtype),
                  preferred_element_type=jnp.float32)
    for k in range(1, gdep + 1):
        h = ax + jnp.dot(m, h.astype(mxu_dtype), preferred_element_type=jnp.float32)
        acc += jnp.dot(h.reshape(v * tb, c).astype(mxu_dtype),
                       w1_ref[k * c:(k + 1) * c, :].astype(mxu_dtype),
                       preferred_element_type=jnp.float32)

    z = jax.nn.sigmoid(acc + b1_ref[...])
    z = jax.nn.sigmoid(jnp.dot(z.astype(mxu_dtype), w2_ref[...].astype(mxu_dtype),
                               preferred_element_type=jnp.float32) + b2_ref[...])
    y = jnp.dot(z.astype(mxu_dtype), w3_ref[...].astype(mxu_dtype),
                preferred_element_type=jnp.float32) + b3_ref[...]
    o_ref[...] = y.reshape(v, tb, out).astype(o_ref.dtype)


# ---------------------------------------------------------------------------
# Tile pickers
# ---------------------------------------------------------------------------
def _pick_rnn_tile(n, v, c, out, target_rows=256, min_grid=2,
                   vmem_block_budget=8 << 20):
    """Batch tile for the RNN path (rows of the epilogue matmul = tb*v)."""
    tb = min(n, max(1, -(-target_rows // v)))
    if n >= min_grid:
        # Keep >=2 grid steps so the 'parallel' axis can shard across v7x's 2 TCs.
        tb = min(tb, max(1, n // min_grid))
    # Cap the double-buffered per-step f32 blocks (x + fused adjacency + out).
    per_elem = 4 * (v * c + v * v + v * out)
    while tb > 1 and 2 * tb * per_elem > vmem_block_budget:
        tb -= 1
    while tb > 1 and n % tb:
        tb -= 1
    return max(tb, 1)


def _pick_hyper_tile(n, c, target_lanes=256):
    """Batch tile for the hyper path; the block's second-minor dim (tb) must be
    8-aligned or the full batch, and tb*c fills the lanes of each hop matmul."""
    want = max(1, -(-target_lanes // c))
    cands = [tb for tb in range(1, n + 1)
             if n % tb == 0 and (tb == n or tb % 8 == 0)]
    geq = [tb for tb in cands if tb >= want]
    return min(geq) if geq else max(cands)


# ---------------------------------------------------------------------------
# Wrappers
# ---------------------------------------------------------------------------
def gcn_rnn_forward(x, adj0, adj1, w, b, *, gdep, alpha, beta, gamma,
                    mxu_dtype=jnp.float32):
    """type='RNN'. x:(N,V,C) adj0:(N,V,V) adj1:(V,V) w:((gdep+1)C,OUT) b:(OUT,)."""
    n, v, c = x.shape
    out = w.shape[1]
    assert w.shape[0] == (gdep + 1) * c

    # Fused, pre-transposed diffusion operator, hoisted out of the kernel.
    m = beta * jnp.swapaxes(adj0, -1, -2) + gamma * adj1.T[None, :, :]
    b2d = b.reshape(1, out)

    tb = _pick_rnn_tile(n, v, c, out)
    kernel = functools.partial(_gcn_rnn_kernel, gdep=gdep, alpha=alpha,
                               mxu_dtype=mxu_dtype)
    return pl.pallas_call(
        kernel,
        out_shape=jax.ShapeDtypeStruct((n, v, out), jnp.float32),
        grid_spec=pltpu.PrefetchScalarGridSpec(
            num_scalar_prefetch=0,
            grid=(n // tb,),
            in_specs=[
                pl.BlockSpec((tb, v, c), lambda i: (i, 0, 0)),
                pl.BlockSpec((tb, v, v), lambda i: (i, 0, 0)),
                pl.BlockSpec(w.shape, lambda i: (0, 0)),
                pl.BlockSpec((1, out), lambda i: (0, 0)),
            ],
            out_specs=pl.BlockSpec((tb, v, out), lambda i: (i, 0, 0)),
        ),
        compiler_params=pltpu.CompilerParams(
            dimension_semantics=("parallel",),
            vmem_limit_bytes=32 * 1024 * 1024),
    )(x, m, w, b2d)


def gcn_hyper_forward(x, adj, params, *, gdep, alpha, gamma,
                      mxu_dtype=jnp.float32):
    """type='hyper'. x:(N,V,C) adj:(V,V) params=(w1,b1,w2,b2,w3,b3), weights (in,out)."""
    n, v, c = x.shape
    w1, b1, w2, b2, w3, b3 = params
    out = w3.shape[1]
    assert w1.shape[0] == (gdep + 1) * c

    h1, h2 = w1.shape[1], w2.shape[1]
    h1p, h2p = _round_up(h1, LANES), _round_up(h2, LANES)
    # Lane-pad the hidden dims with zeros; zero ROWS of the next layer make the
    # extra sigmoid(0)=0.5 columns contribute exactly nothing -> bit-exact.
    w1p = jnp.pad(w1, ((0, 0), (0, h1p - h1)))
    b1p = jnp.pad(b1, (0, h1p - h1)).reshape(1, h1p)
    w2p = jnp.pad(w2, ((0, h1p - h1), (0, h2p - h2)))
    b2p = jnp.pad(b2, (0, h2p - h2)).reshape(1, h2p)
    w3p = jnp.pad(w3, ((0, h2p - h2), (0, 0)))
    b3p = b3.reshape(1, out)

    # Node-major layout so each diffusion hop is one (V,V)@(V,TB*C) matmul.
    xt = jnp.transpose(x, (1, 0, 2))          # (V, N, C)
    at = gamma * adj.T                        # gamma folded into the operator

    tb = _pick_hyper_tile(n, c)
    kernel = functools.partial(_gcn_hyper_kernel, gdep=gdep, alpha=alpha,
                               mxu_dtype=mxu_dtype)
    res = pl.pallas_call(
        kernel,
        out_shape=jax.ShapeDtypeStruct((v, n, out), jnp.float32),
        grid_spec=pltpu.PrefetchScalarGridSpec(
            num_scalar_prefetch=0,
            grid=(n // tb,),
            in_specs=[
                pl.BlockSpec((v, tb, c), lambda i: (0, i, 0)),
                pl.BlockSpec((v, v), lambda i: (0, 0)),
                pl.BlockSpec(w1p.shape, lambda i: (0, 0)),
                pl.BlockSpec((1, h1p), lambda i: (0, 0)),
                pl.BlockSpec((h1p, h2p), lambda i: (0, 0)),
                pl.BlockSpec((1, h2p), lambda i: (0, 0)),
                pl.BlockSpec((h2p, out), lambda i: (0, 0)),
                pl.BlockSpec((1, out), lambda i: (0, 0)),
            ],
            out_specs=pl.BlockSpec((v, tb, out), lambda i: (0, i, 0)),
        ),
        compiler_params=pltpu.CompilerParams(
            dimension_semantics=("parallel",),
            vmem_limit_bytes=32 * 1024 * 1024),
    )(xt, at, w1p, b1p, w2p, b2p, w3p, b3p)
    return jnp.transpose(res, (1, 0, 2))      # back to (N, V, OUT)


# ---------------------------------------------------------------------------
# Pure-JAX references (mirror the PyTorch module exactly)
# ---------------------------------------------------------------------------
def _ref_rnn(x, adj0, adj1, w, b, gdep, alpha, beta, gamma):
    h = x
    outs = [h]
    for _ in range(gdep):
        g0 = jnp.einsum('nvc,nvw->nwc', h, adj0)
        g1 = jnp.einsum('nvc,vw->nwc', h, adj1)
        h = alpha * x + beta * g0 + gamma * g1
        outs.append(h)
    ho = jnp.concatenate(outs, axis=-1)
    return ho @ w + b


def _ref_hyper(x, adj, params, gdep, alpha, gamma):
    w1, b1, w2, b2, w3, b3 = params
    h = x
    outs = [h]
    for _ in range(gdep):
        g = jnp.einsum('nvc,vw->nwc', h, adj)
        h = alpha * x + gamma * g
        outs.append(h)
    ho = jnp.concatenate(outs, axis=-1)
    z = jax.nn.sigmoid(ho @ w1 + b1)
    z = jax.nn.sigmoid(z @ w2 + b2)
    return z @ w3 + b3


# ---------------------------------------------------------------------------
# Main
# ---------------------------------------------------------------------------
if __name__ == "__main__":
    key = jax.random.PRNGKey(0)

    # Small shapes consistent with the module's forward.
    N, V, C = 2, 16, 32            # batch, graph nodes, input channels (dims[0])
    gdep = 2
    alpha, beta, gamma = 0.05, 0.95, 0.95

    # ---------------- type = 'RNN' ----------------
    dims_rnn = (C, 64)             # Linear((gdep+1)*dims[0], dims[1])
    k0, k1, k2, k3, k4 = jax.random.split(key, 5)
    x = jax.random.normal(k0, (N, V, C), dtype=jnp.float32)
    adj0 = jax.nn.softmax(jax.random.normal(k1, (N, V, V), dtype=jnp.float32), axis=-1)
    adj1 = jax.nn.softmax(jax.random.normal(k2, (V, V), dtype=jnp.float32), axis=-1)
    w_rnn = 0.1 * jax.random.normal(k3, ((gdep + 1) * dims_rnn[0], dims_rnn[1]),
                                    dtype=jnp.float32)   # already (in, out)
    b_rnn = 0.1 * jax.random.normal(k4, (dims_rnn[1],), dtype=jnp.float32)

    out_rnn = gcn_rnn_forward(x, adj0, adj1, w_rnn, b_rnn,
                              gdep=gdep, alpha=alpha, beta=beta, gamma=gamma)
    out_rnn = jax.block_until_ready(out_rnn)
    ref_rnn = _ref_rnn(x, adj0, adj1, w_rnn, b_rnn, gdep, alpha, beta, gamma)
    assert out_rnn.shape == (N, V, dims_rnn[1])
    assert jnp.allclose(out_rnn, ref_rnn, atol=1e-3, rtol=1e-3)

    # ---------------- type = 'hyper' ----------------
    dims_hyp = (C, 16, 16, 64)     # fc1/fc2/fc3 sizes
    k5, k6, k7, k8, k9, k10 = jax.random.split(jax.random.PRNGKey(1), 6)
    w1 = 0.1 * jax.random.normal(k5, ((gdep + 1) * dims_hyp[0], dims_hyp[1]), jnp.float32)
    b1 = 0.1 * jax.random.normal(k6, (dims_hyp[1],), jnp.float32)
    w2 = 0.1 * jax.random.normal(k7, (dims_hyp[1], dims_hyp[2]), jnp.float32)
    b2 = 0.1 * jax.random.normal(k8, (dims_hyp[2],), jnp.float32)
    w3 = 0.1 * jax.random.normal(k9, (dims_hyp[2], dims_hyp[3]), jnp.float32)
    b3 = 0.1 * jax.random.normal(k10, (dims_hyp[3],), jnp.float32)
    params_hyp = (w1, b1, w2, b2, w3, b3)

    out_hyp = gcn_hyper_forward(x, adj1, params_hyp,
                                gdep=gdep, alpha=alpha, gamma=gamma)
    out_hyp = jax.block_until_ready(out_hyp)
    ref_hyp = _ref_hyper(x, adj1, params_hyp, gdep, alpha, gamma)
    assert out_hyp.shape == (N, V, dims_hyp[3])
    assert jnp.allclose(out_hyp, ref_hyp, atol=1e-3, rtol=1e-3)

    # TODO(synk): pass mxu_dtype=jnp.bfloat16 on v5e/v6e/v7x for bf16 MXU operands
    # (f32 accumulation); requires loosening the allclose tolerance above.
    print("KERNEL_OK")
</pallas_src>

<mosaic_0001>
module attributes {stable_mosaic.version = 11 : i64} {
  func.func @_gcn_rnn_kernel(%arg0: i32, %arg1: memref<1x16x32xf32, #tpu.memory_space<vmem>>, %arg2: memref<1x16x16xf32, #tpu.memory_space<vmem>>, %arg3: memref<96x64xf32, #tpu.memory_space<vmem>>, %arg4: memref<1x64xf32, #tpu.memory_space<vmem>>, %arg5: memref<1x16x64xf32, #tpu.memory_space<vmem>>) attributes {dimension_semantics = [#tpu.dimension_semantics<parallel>], iteration_bounds = array<i64: 2>, scalar_prefetch = 0 : i64, scratch_operands = 0 : i64, tpu.core_type = #tpu.core_type<tc>, window_params = [{transform_indices = @transform_0, window_bounds = array<i64: 1, 16, 32>}, {transform_indices = @transform_1, window_bounds = array<i64: 1, 16, 16>}, {pipeline_mode = #tpu.pipeline_mode<synchronous>, transform_indices = @transform_2, window_bounds = array<i64: 96, 64>}, {pipeline_mode = #tpu.pipeline_mode<synchronous>, transform_indices = @transform_3, window_bounds = array<i64: 1, 64>}, {transform_indices = @transform_4, window_bounds = array<i64: 1, 16, 64>}]} {
    %c0 = arith.constant 0 : index
    %c0_0 = arith.constant 0 : index
    %c0_1 = arith.constant 0 : index
    %0 = vector.load %arg1[%c0, %c0_0, %c0_1] : memref<1x16x32xf32, #tpu.memory_space<vmem>>, vector<1x16x32xf32>
    %c0_2 = arith.constant 0 : index
    %c0_3 = arith.constant 0 : index
    %c0_4 = arith.constant 0 : index
    %1 = vector.load %arg2[%c0_2, %c0_3, %c0_4] : memref<1x16x16xf32, #tpu.memory_space<vmem>>, vector<1x16x16xf32>
    %cst = arith.constant 5.000000e-02 : f32
    %2 = vector.broadcast %cst : f32 to vector<1x16x32xf32>
    %3 = arith.mulf %2, %0 : vector<1x16x32xf32>
    %4 = vector.shape_cast %0 : vector<1x16x32xf32> to vector<16x32xf32>
    %c0_5 = arith.constant 0 : index
    %c0_6 = arith.constant 0 : index
    %5 = vector.load %arg3[%c0_5, %c0_6] : memref<96x64xf32, #tpu.memory_space<vmem>>, vector<32x64xf32>
    %cst_7 = arith.constant dense<0.000000e+00> : vector<16x64xf32>
    %6 = tpu.matmul %4, %5, %cst_7 {dimension_numbers = #tpu.dot_dimension_numbers<[1], [0], [0], [1], [0, 0, 1, 1], [], []>} : vector<16x32xf32>, vector<32x64xf32>, vector<16x64xf32> -> vector<16x64xf32>
    "tpu.trace_start"() <{level = 10 : i32, message = "bwv,bvc->bwc"}> : () -> ()
    %cst_8 = arith.constant dense<0.000000e+00> : vector<1x16x32xf32>
    %7 = tpu.matmul %1, %0, %cst_8 {dimension_numbers = #tpu.dot_dimension_numbers<[2], [1], [1], [2], [0, 0, 0, 1, 1, 2], [0], [0]>} : vector<1x16x16xf32>, vector<1x16x32xf32>, vector<1x16x32xf32> -> vector<1x16x32xf32>
    "tpu.trace_stop"() : () -> ()
    %8 = arith.addf %3, %7 : vector<1x16x32xf32>
    %9 = vector.shape_cast %8 : vector<1x16x32xf32> to vector<16x32xf32>
    %c32 = arith.constant 32 : index
    %c0_9 = arith.constant 0 : index
    %10 = vector.load %arg3[%c32, %c0_9] : memref<96x64xf32, #tpu.memory_space<vmem>>, vector<32x64xf32>
    %cst_10 = arith.constant dense<0.000000e+00> : vector<16x64xf32>
    %11 = tpu.matmul %9, %10, %cst_10 {dimension_numbers = #tpu.dot_dimension_numbers<[1], [0], [0], [1], [0, 0, 1, 1], [], []>} : vector<16x32xf32>, vector<32x64xf32>, vector<16x64xf32> -> vector<16x64xf32>
    %12 = arith.addf %6, %11 : vector<16x64xf32>
    "tpu.trace_start"() <{level = 10 : i32, message = "bwv,bvc->bwc"}> : () -> ()
    %cst_11 = arith.constant dense<0.000000e+00> : vector<1x16x32xf32>
    %13 = tpu.matmul %1, %8, %cst_11 {dimension_numbers = #tpu.dot_dimension_numbers<[2], [1], [1], [2], [0, 0, 0, 1, 1, 2], [0], [0]>} : vector<1x16x16xf32>, vector<1x16x32xf32>, vector<1x16x32xf32> -> vector<1x16x32xf32>
    "tpu.trace_stop"() : () -> ()
    %14 = arith.addf %3, %13 : vector<1x16x32xf32>
    %15 = vector.shape_cast %14 : vector<1x16x32xf32> to vector<16x32xf32>
    %c64 = arith.constant 64 : index
    %c0_12 = arith.constant 0 : index
    %16 = vector.load %arg3[%c64, %c0_12] : memref<96x64xf32, #tpu.memory_space<vmem>>, vector<32x64xf32>
    %cst_13 = arith.constant dense<0.000000e+00> : vector<16x64xf32>
    %17 = tpu.matmul %15, %16, %cst_13 {dimension_numbers = #tpu.dot_dimension_numbers<[1], [0], [0], [1], [0, 0, 1, 1], [], []>} : vector<16x32xf32>, vector<32x64xf32>, vector<16x64xf32> -> vector<16x64xf32>
    %18 = arith.addf %12, %17 : vector<16x64xf32>
    %c0_14 = arith.constant 0 : index
    %c0_15 = arith.constant 0 : index
    %19 = vector.load %arg4[%c0_14, %c0_15] : memref<1x64xf32, #tpu.memory_space<vmem>>, vector<1x64xf32>
    %20 = vector.broadcast %19 : vector<1x64xf32> to vector<16x64xf32>
    %21 = arith.addf %18, %20 : vector<16x64xf32>
    %22 = vector.shape_cast %21 : vector<16x64xf32> to vector<1x16x64xf32>
    %c0_16 = arith.constant 0 : index
    %c0_17 = arith.constant 0 : index
    %c0_18 = arith.constant 0 : index
    %23 = vector.load %arg5[%c0_16, %c0_17, %c0_18] : memref<1x16x64xf32, #tpu.memory_space<vmem>>, vector<1x16x64xf32>
    tpu.vector_store %arg5[%c0_16, %c0_17, %c0_18], %22 {strides = array<i32>} : memref<1x16x64xf32, #tpu.memory_space<vmem>>, vector<1x16x64xf32>,
    return
  }
  func.func @transform_0(%arg0: i32) -> (i32, i32, i32) {
    %c0_i32 = arith.constant 0 : i32
    %c0_i32_0 = arith.constant 0 : i32
    %c0_i32_1 = arith.constant 0 : i32
    return %arg0, %c0_i32, %c0_i32_0 : i32, i32, i32
  }
  func.func @transform_1(%arg0: i32) -> (i32, i32, i32) {
    %c0_i32 = arith.constant 0 : i32
    %c0_i32_0 = arith.constant 0 : i32
    %c0_i32_1 = arith.constant 0 : i32
    return %arg0, %c0_i32, %c0_i32_0 : i32, i32, i32
  }
  func.func @transform_2(%arg0: i32) -> (i32, i32) {
    %c0_i32 = arith.constant 0 : i32
    %c0_i32_0 = arith.constant 0 : i32
    %c0_i32_1 = arith.constant 0 : i32
    return %c0_i32, %c0_i32_0 : i32, i32
  }
  func.func @transform_3(%arg0: i32) -> (i32, i32) {
    %c0_i32 = arith.constant 0 : i32
    %c0_i32_0 = arith.constant 0 : i32
    %c0_i32_1 = arith.constant 0 : i32
    return %c0_i32, %c0_i32_0 : i32, i32
  }
  func.func @transform_4(%arg0: i32) -> (i32, i32, i32) {
    %c0_i32 = arith.constant 0 : i32
    %c0_i32_0 = arith.constant 0 : i32
    %c0_i32_1 = arith.constant 0 : i32
    return %arg0, %c0_i32, %c0_i32_0 : i32, i32, i32
  }
}

</mosaic_0001>

<bundles_post_ra>
// kernel: tpu_custom_call.1
= control target key start
LH: loop header
LB: loop body
LE: loop exit
PB: predicated region body
PF: predicated region fallthrough
CT: control target
= control target key end

     0   :  { %9 = vsyncpa [#allocation3], 0  ;;  %s779_s0 = inlined_call_operand.vmem [shape: f32[2,16,32], index: 0, kind: input, shape index: {}]   ;;  %s780_s1 = inlined_call_operand.vmem [shape: f32[2,16,16], index: 1, kind: input, shape index: {}]   ;;  %s781_s2 = inlined_call_operand.vmem [shape: f32[96,64], index: 2, kind: input, shape index: {}]   ;;  %s782_s3 = inlined_call_operand.vmem [shape: f32[1,64], index: 3, kind: input, shape index: {}]   ;;  %s783_s4 = inlined_call_operand.hbm [shape: f32[2,16,64], index: 4, kind: output, shape index: {}]  }
   0x1   :  { %11 = vsyncpa [#allocation3 + $0x1], 0  ;;  %s642_s15 = smov 0   ;;  %s644_s16 = smov 0  }
   0x2   :  { %s646_s17 = smov 0   ;;  %s648_s18 = smov 0  }
   0x3 LB: > { %s663_s19 = sadd.s32 4294967295, %s613_s18   ;;  %s480_s20 = sadd.s32 4294967294, %s613_s18   ;;  %s613_s18 = sphi %s648_s18, %s789_s18   ;;  %s609_s17 = sphi %s646_s17, %s788_s17   ;;  %s605_s16 = sphi %s644_s16, %s787_s16   ;;  %s601_s15 = sphi %s642_s15, %s786_s15  }
   0x4   : > { %s667_s21 = sadd.s32 1, %s613_s18   ;;  %s118_s22 = sadd.s32 1, %s609_s17 }
   0x5   : > { %s115_s23 = ssub.s32 %s613_s18, %s667_s21  ;;  %p128_p0 = scmp.ne.s32.totalorder %s609_s17, %s605_s16 }
   0x6   : > { %p116_p1 = scmp.eq.s32.totalorder %s115_s23, 0  ;;  %p129_p2 = scmp.eq.s32.totalorder %s663_s19, 1 }
   0x7   : > { %p134_p3 = scmp.ne.s32.totalorder %s605_s16, %s601_s15  ;;  %p135_p4 = scmp.eq.s32.totalorder %s480_s20, 1 }
   0x8   : > { %s678_s24 = scalar_select %p116_p1, %s609_s17, %s118_s22  }
   0x9   : > { %p680_p5 = por %p129_p2, %p128_p0  ;;  %p684_p6 = por %p135_p4, %p134_p3 }
   0xa   : > { %p483_p7 = scmp.ge.s32.totalorder %s613_s18, 1  ;;  %p175_p8 = scmp.lt.s32.totalorder %s613_s18, 3 }
   0xc   : > { %p176_p9 = pnand %p483_p7, %p175_p8 }
   0xd   : > { %p206_p10 = scmp.lt.s32.totalorder (!%p176_p9), %s663_s19, 1  ;;  %s203_s22 = sand.u32 (!%p176_p9), 1, %s605_s16  }
   0xe   : > { %179 = sbr.rel (%p176_p9) target bundleno = 441 (0x1b9), region = 36  ;;  %s484_s23 = sshll.u32 (!%p176_p9), %s203_s22, 4 }
   0xf   : > { %s506_s29 = sshll.u32 (!%p176_p9), %s663_s19, 4  ;;  %s205_s7 = scalar_lea.vmem (!%p176_p9), [#allocation2], %s484_s23 }
  0x10   : > { %s402_s6 = scalar_lea.hbm (!%p176_p9), %s783_s4, %s506_s29  ;;  %s403_s8 = sshll.u32 (!%p176_p9), %s205_s7, 4  ;;  %s404_s8 = int_to_ptr.vmem [resolvable:$true] %s403_s8 }
  0x11   : > { %s571_s14 = scalar_lea.hbm (!%p176_p9), %s783_s4, 32 }
  0x13   : > { %v225_v0 = vld [vmem:[%s781_s2 + $0x18] sm:$0xff]  ;;  %v224_v1 = vld [vmem:[%s781_s2 + $0x10] sm:$0xff]  ;;  %s207_s9 = scalar_select %p206_p10, %s663_s19, 1  ;;  %v223_v4 = vld [vmem:[%s781_s2 + $0x8] sm:$0xff]  ;;  %vm226_vm0 = vcmask 130048   ;;  %vm262_vm1 = vcmask 261120  }
  0x14   : > { %310 = vmatpush.msra.mxu2 %v225_v0  ;;  %v261_v2 = vld [vmem:[%s781_s2 + $0x38] sm:$0xff]  ;;  %v260_v3 = vld [vmem:[%s781_s2 + $0x30] sm:$0xff]  ;;  %v222_v5 = vld [vmem:[%s781_s2] sm:$0xff]  ;;  %vm387_vm2 = vcmask 523264   ;;  %s391_s19 = scalar_lea.sflag [#allocation3], %s203_s22 }
  0x15   : > { %281 = vmatpush.msra.mxu1 %v261_v2  ;;  %s504_s12 = sshll.u32 %s207_s9, 4  ;;  %v259_v10 = vld [vmem:[%s781_s2 + $0x28] sm:$0xff]  ;;  %v258_v11 = vld [vmem:[%s781_s2 + $0x20] sm:$0xff]  ;;  %v349_v18 = vld [vmem:[%s781_s2 + $0x58] sm:$0xff]  ;;  %s405_s9 = sshll.u32 %s402_s6, 4  ;;  %s406_s9 = int_to_ptr.hbm [resolvable:$true] %s405_s9 }
  0x16   : > { %311 = vmatpush.msra.mxu2 %v224_v1  ;;  %s210_s20 = scalar_lea.vmem %s779_s0, %s504_s12  ;;  %s215_s27 = scalar_lea.vmem %s780_s1, %s504_s12  ;;  %v348_v19 = vld [vmem:[%s781_s2 + $0x50] sm:$0xff]  ;;  %v347_v20 = vld [vmem:[%s781_s2 + $0x48] sm:$0xff]  ;;  %v346_v21 = vld [vmem:[%s781_s2 + $0x40] sm:$0xff] }
  0x17   : > { %282 = vmatpush.msra.mxu1 %v260_v3  ;;  %v217_v6 = vld [vmem:[%s210_s20 + $0x8] sm:$0xff]  ;;  %v216_v7 = vld [vmem:[%s210_s20] sm:$0xff]  ;;  %s565_s10 = sshra.s32 %s406_s9, 4  ;;  %s566_s10 = int_to_ptr.hbm [resolvable:$true] %s565_s10 }
  0x18   : > { %312 = vmatpush.msra.mxu2 %v223_v4  ;;  %247 = vmatpush.msra.mxu0 %v217_v6  ;;  %v218_v8 = vld [vmem:[%s215_s27] sm:$0xff]  ;;  %v219_v9 = vld [vmem:[%s215_s27 + $0x8] sm:$0xff]  ;;  %v220_v12 = vmul.f32 0.05, %v216_v7  ;;  %v221_v15 = vmul.f32 0.05, %v217_v6  ;;  %p572_p0 = scmp.lt.s32.totalorder %s566_s10, %s783_s4 }
  0x19   : > { %507 = vmatpush.msra.mxu3 %v217_v6  ;;  %283 = vmatpush.msra.mxu1 %v259_v10  ;;  %v550_v29 = vld [vmem:[%s782_s3] ss:$0 sm:$0xff]  ;;  %s567_s11 = scalar_lea.hbm %s566_s10, 16 }
  0x1a   : > { %313 = vmatpush.msra.mxu2 %v222_v5  ;;  %248 = vmatpush.msra.mxu0 %v216_v7  ;;  %p568_p11 = scmp.ne.s32.totalorder %s566_s10, %s567_s11  ;;  %p573_p1 = scmp.lt.s32.totalorder %s571_s14, %s567_s11 }
  0x1b   : > { %508 = vmatpush.msra.mxu3 %v216_v7  ;;  %489 = vmatmul.msk.f32.vlgmr.msra.gmra.mxu0 %vm226_vm0, %v218_v8 }
  0x1c   : > { %490 = vmatmul.msk.f32.vlgmr.msra.gmra.mxu3 %vm226_vm0, %v219_v9  ;;  %493 = vmatmul.msk.f32.vlgmr.msra.gmra.mxu2 %vm262_vm1, %v216_v7  ;;  %p569_p12 = pnand %p568_p11, %p680_p5  ;;  %p574_p2 = por %p573_p1, %p572_p0 }
  0x1d   : > { %284 = vmatpush.msra.mxu1 %v258_v11  ;;  %368 = vmatpush.msrb.mxu0 %v349_v18 }
  0x1e   : > { %p570_p13 = pneg %p569_p12 }
  0x1f   : > { %369 = vmatpush.msrb.mxu0 %v348_v19 }
  0x20   : > { %p575_p3 = pnand %p574_p2, %p570_p13 }
  0x21   : > { %370 = vmatpush.msrb.mxu0 %v347_v20 }
  0x23   : > { %371 = vmatpush.msrb.mxu0 %v346_v21 }
  0x24   : > { %494 = vmatmul.msk.f32.gmra.mxu2 %vm262_vm1, %v217_v6 }
  0x98   : > { %v250_v13 = vpop.f32.mrf.mxu0 }
  0x99   : > { %v256_v14 = vadd.f32 %v250_v13, %v220_v12 }
  0x9b   : > { %491 = vmatmul.msk.f32.vlgmr.msra.gmra.mxu1 %vm262_vm1, %v256_v14 }
  0x9f   : > { %v253_v16 = vpop.f32.mrf.mxu3  ;;  %v315_v27 = vpop.f32.mrf.mxu2 }
  0xa0   : > { %v257_v17 = vadd.f32 %v253_v16, %v221_v15 }
  0xa2   : > { %335 = vmatpush.msrb.mxu3 %v257_v17 }
  0xa3   : > { %492 = vmatmul.msk.f32.gmra.mxu1 %vm262_vm1, %v257_v17 }
  0xa4   : > { %336 = vmatpush.msrb.mxu3 %v256_v14 }
  0xa5   : > { %495 = vmatmul.msk.f32.vlgmr.msrb.gmra.mxu3 %vm226_vm0, %v218_v8 }
  0xa7   : > { %v318_v34 = vpop.f32.mrf.mxu2 }
  0xad   : > { %496 = vmatmul.msk.f32.gmra.mxu3 %vm226_vm0, %v219_v9 }
 0x118   : > { %v286_v26 = vpop.f32.mrf.mxu1 }
 0x119   : > { %v316_v28 = vadd.f32 %v315_v27, %v286_v26 }
 0x120   : > { %v289_v33 = vpop.f32.mrf.mxu1 }
 0x121   : > { %v319_v35 = vadd.f32 %v318_v34, %v289_v33 }
 0x128   : > { %v338_v22 = vpop.f32.mrf.mxu3 }
 0x129   : > { %v344_v23 = vadd.f32 %v338_v22, %v220_v12 }
 0x12b   : > { %497 = vmatmul.msk.f32.vlgmr.msrb.gmra.mxu0 %vm262_vm1, %v344_v23 }
 0x130   : > { %v341_v24 = vpop.f32.mrf.mxu3 }
 0x131   : > { %v345_v25 = vadd.f32 %v341_v24, %v221_v15 }
 0x133   : > { %498 = vmatmul.msk.f32.gmra.mxu0 %vm262_vm1, %v345_v25 }
 0x1a8   : > { %v373_v30 = vpop.f32.mrf.mxu0 }
 0x1a9   : > { %v379_v31 = vadd.f32 %v373_v30, %v316_v28 }
 0x1ab   : > { %v385_v32 = vadd.f32 %v550_v29, %v379_v31 }
 0x1ad   : > { %388 = vst.msk [vmem:[%s205_s7] sm:$0xff] %vm387_vm2, %v385_v32 }
 0x1b0   : > { %v376_v36 = vpop.f32.mrf.mxu0 }
 0x1b1   : > { %v380_v37 = vadd.f32 %v376_v36, %v319_v35 }
 0x1b3   : > { %v386_v38 = vadd.f32 %v550_v29, %v380_v37 }
 0x1b5   : > { %389 = vst.msk [vmem:[%s205_s7 + $0x8] sm:$0xff] %vm387_vm2, %v386_v38 }
 0x1b6   : > { %578 = shalt.err (!%p575_p3)
}
 0x1b7   : > { %s615_s22 = smov 128   ;;  %s616_s27 = smov 8  }
 0x1b8   : > { %509 = dma.vmem_to_hbm [thread:$0]  (%p680_p5), %s404_s8, 256, %s406_s9, %s391_s19, %s615_s22, %s615_s22, %s616_s27  }
 0x1b9 PF: > { %p515_p4 = scmp.ge.s32.totalorder %s613_s18, 2  ;;  %s420_s28 = sand.u32 1, %s601_s15  }
 0x1ba   : > { %s421_s29 = scalar_lea.sflag [#allocation3], %s420_s28 }
 0x1bb   : > { %p512_p7 = pnand %p515_p4, %p684_p6 }
 0x1bd   : > { %p513_p8 = pneg %p512_p7 }
 0x1bf   : > { %596 = dma.done.wait (%p513_p8), %s421_s29, 256  }
 0x1c0   : > { %598 = vsyncadd (%p513_p8), %s421_s29, 4294967040  ;;  %p14_p9 = scmp.ge.s32.totalorder %s667_s21, 4   ;;  %s786_s15 = smov %s605_s16 }
 0x1c1   : > { %s787_s16 = smov %s609_s17  ;;  %s788_s17 = smov %s678_s24 }
 0x1c2   : > { %s789_s18 = smov %s667_s21  ;;  %16 = sbr.rel (!%p14_p9) target bundleno = 3 (0x3), region = 74 }
 0x1c7   :  { %427 = vsyncpa [#allocation3], 1 }
 0x1c8   :  { %429 = vsyncpa [#allocation3 + $0x1], 1 }

</bundles_post_ra>
